<compile_context>
chip_gen: v7x
topology: tpu7x:2x2x1
jax: 0.10.0
libtpu: 0.0.40
codegen_flags: <defaults>
</compile_context>

<pallas_src>
import jax
import jax.numpy as jnp
from jax.experimental import pallas as pl
from jax.experimental.pallas import tpu as pltpu


def _soft_ce_kernel(pred_ref, tgt_ref, loss_ref):
    """One row-block: per-row soft cross entropy, written as (tn, 1)."""
    x = pred_ref[...].astype(jnp.float32)          # (tn, Cp)
    t = tgt_ref[...].astype(jnp.float32)           # (tn, Cp)

    # numerically stable log-softmax along the last (lane) axis
    m = jnp.max(x, axis=-1, keepdims=True)         # (tn, 1)
    z = x - m
    lse = jnp.log(jnp.sum(jnp.exp(z), axis=-1, keepdims=True))   # (tn, 1)

    # -sum(t * logp) = sum(t * (lse - z)); padded lanes have t == 0.
    loss_ref[...] = jnp.sum(t * (lse - z), axis=-1, keepdims=True)  # (tn, 1)


def soft_cross_entropy(pred, soft_targets, *, vmem_budget_bytes=24 * 1024 * 1024):
    """pred, soft_targets: (N, C) arrays (f32 or bf16). Returns scalar f32 loss."""
    N, C = pred.shape
    assert soft_targets.shape == (N, C)

    itemsize = max(jnp.dtype(pred.dtype).itemsize,
                   jnp.dtype(soft_targets.dtype).itemsize)

    # Lane-dense class dimension.
    c_pad = ((C + 127) // 128) * 128

    # Row tile: 2 inputs x 2 pipeline buffers per step, fit the VMEM budget.
    per_row_bytes = 2 * 2 * c_pad * itemsize
    tn = vmem_budget_bytes // per_row_bytes
    tn = int(max(8, min(tn, 4096)))
    tn = (tn // 8) * 8
    n_ceil8 = ((N + 7) // 8) * 8
    tn = min(tn, n_ceil8)                           # don't pad tiny N up to 4096
    n_pad = ((N + tn - 1) // tn) * tn

    # Pad the class dim: logits get a large negative value (keeps logsumexp
    # exact, avoids inf*0 = nan), targets get zero.
    if c_pad != C:
        pred = jnp.pad(pred, ((0, 0), (0, c_pad - C)), constant_values=-1e30)
        soft_targets = jnp.pad(soft_targets, ((0, 0), (0, c_pad - C)))
    # Pad rows: zero targets -> zero loss contribution; divisor stays true N.
    if n_pad != N:
        pred = jnp.pad(pred, ((0, n_pad - N), (0, 0)))
        soft_targets = jnp.pad(soft_targets, ((0, n_pad - N), (0, 0)))

    grid = (n_pad // tn,)

    # Explicit scoped-VMEM limit: needed bytes + headroom, capped well under
    # v7x's 64 MiB physical VMEM, and above v5e's 16 MiB default.
    vmem_limit = int(per_row_bytes * tn * 1.5) + (4 << 20)
    vmem_limit = max(16 << 20, min(vmem_limit, 48 << 20))

    row_losses = pl.pallas_call(
        _soft_ce_kernel,
        out_shape=jax.ShapeDtypeStruct((n_pad, 1), jnp.float32),
        grid_spec=pltpu.PrefetchScalarGridSpec(
            num_scalar_prefetch=0,
            grid=grid,
            in_specs=[
                pl.BlockSpec((tn, c_pad), lambda i: (i, 0)),
                pl.BlockSpec((tn, c_pad), lambda i: (i, 0)),
            ],
            out_specs=pl.BlockSpec((tn, 1), lambda i: (i, 0)),
        ),
        compiler_params=pltpu.CompilerParams(
            dimension_semantics=("parallel",),
            vmem_limit_bytes=vmem_limit,
        ),
    )(pred, soft_targets)

    # Tiny epilogue reduction + mean over the TRUE number of rows.
    return jnp.sum(row_losses) / jnp.float32(N)


def _reference(pred, soft_targets):
    logp = jax.nn.log_softmax(pred.astype(jnp.float32), axis=-1)
    return jnp.mean(jnp.sum(-soft_targets.astype(jnp.float32) * logp, axis=1))


if __name__ == "__main__":
    key = jax.random.PRNGKey(0)
    k1, k2, k3, k4 = jax.random.split(key, 4)

    # Small shapes consistent with the module: (N, C) logits + soft targets.
    N, C = 16, 32
    pred = jax.random.normal(k1, (N, C), dtype=jnp.float32)
    soft_targets = jax.nn.softmax(
        jax.random.normal(k2, (N, C), dtype=jnp.float32), axis=-1)

    loss = jax.block_until_ready(soft_cross_entropy(pred, soft_targets))
    ref = _reference(pred, soft_targets)
    assert jnp.allclose(loss, ref, atol=1e-5, rtol=1e-5), (loss, ref)

    # Ragged N / non-lane-multiple C exercises the padding path.
    N2, C2 = 10, 50
    pred2 = jax.random.normal(k3, (N2, C2), dtype=jnp.float32)
    soft_targets2 = jax.nn.softmax(
        jax.random.normal(k4, (N2, C2), dtype=jnp.float32), axis=-1)
    loss2 = jax.block_until_ready(soft_cross_entropy(pred2, soft_targets2))
    ref2 = _reference(pred2, soft_targets2)
    assert jnp.allclose(loss2, ref2, atol=1e-5, rtol=1e-5), (loss2, ref2)

    print("KERNEL_OK")
</pallas_src>

<mosaic_0001>
module attributes {stable_mosaic.version = 11 : i64} {
  func.func @_soft_ce_kernel(%arg0: i32, %arg1: memref<16x128xf32, #tpu.memory_space<vmem>>, %arg2: memref<16x128xf32, #tpu.memory_space<vmem>>, %arg3: memref<16x1xf32, #tpu.memory_space<vmem>>) attributes {dimension_semantics = [#tpu.dimension_semantics<parallel>], iteration_bounds = array<i64: 1>, scalar_prefetch = 0 : i64, scratch_operands = 0 : i64, tpu.core_type = #tpu.core_type<tc>, window_params = [{transform_indices = @transform_0, window_bounds = array<i64: 16, 128>}, {transform_indices = @transform_1, window_bounds = array<i64: 16, 128>}, {transform_indices = @transform_2, window_bounds = array<i64: 16, 1>}]} {
    %c0 = arith.constant 0 : index
    %c0_0 = arith.constant 0 : index
    %0 = vector.load %arg1[%c0, %c0_0] : memref<16x128xf32, #tpu.memory_space<vmem>>, vector<16x128xf32>
    %c0_1 = arith.constant 0 : index
    %c0_2 = arith.constant 0 : index
    %1 = vector.load %arg2[%c0_1, %c0_2] : memref<16x128xf32, #tpu.memory_space<vmem>>, vector<16x128xf32>
    %cst = arith.constant dense<0xFF800000> : vector<16xf32>
    %2 = vector.multi_reduction <maximumf>, %0, %cst [1] : vector<16x128xf32> to vector<16xf32>
    %3 = vector.shape_cast %2 : vector<16xf32> to vector<16x1xf32>
    %4 = vector.broadcast %3 : vector<16x1xf32> to vector<16x128xf32>
    %5 = arith.subf %0, %4 : vector<16x128xf32>
    %6 = math.exp %5 : vector<16x128xf32>
    %cst_3 = arith.constant dense<0.000000e+00> : vector<16xf32>
    %7 = vector.multi_reduction <add>, %6, %cst_3 [1] : vector<16x128xf32> to vector<16xf32>
    %8 = vector.shape_cast %7 : vector<16xf32> to vector<16x1xf32>
    %9 = math.log %8 : vector<16x1xf32>
    %10 = vector.broadcast %9 : vector<16x1xf32> to vector<16x128xf32>
    %11 = arith.subf %10, %5 : vector<16x128xf32>
    %12 = arith.mulf %1, %11 : vector<16x128xf32>
    %cst_4 = arith.constant dense<0.000000e+00> : vector<16xf32>
    %13 = vector.multi_reduction <add>, %12, %cst_4 [1] : vector<16x128xf32> to vector<16xf32>
    %14 = vector.shape_cast %13 : vector<16xf32> to vector<16x1xf32>
    %c0_5 = arith.constant 0 : index
    %c0_6 = arith.constant 0 : index
    %15 = vector.load %arg3[%c0_5, %c0_6] : memref<16x1xf32, #tpu.memory_space<vmem>>, vector<16x1xf32>
    tpu.vector_store %arg3[%c0_5, %c0_6], %14 {strides = array<i32>} : memref<16x1xf32, #tpu.memory_space<vmem>>, vector<16x1xf32>,
    return
  }
  func.func @transform_0(%arg0: i32) -> (i32, i32) {
    %c0_i32 = arith.constant 0 : i32
    %c0_i32_0 = arith.constant 0 : i32
    return %arg0, %c0_i32 : i32, i32
  }
  func.func @transform_1(%arg0: i32) -> (i32, i32) {
    %c0_i32 = arith.constant 0 : i32
    %c0_i32_0 = arith.constant 0 : i32
    return %arg0, %c0_i32 : i32, i32
  }
  func.func @transform_2(%arg0: i32) -> (i32, i32) {
    %c0_i32 = arith.constant 0 : i32
    %c0_i32_0 = arith.constant 0 : i32
    return %arg0, %c0_i32 : i32, i32
  }
}

</mosaic_0001>

<bundles_post_ra>
// kernel: tpu_custom_call.1
= control target key start
LH: loop header
LB: loop body
LE: loop exit
PB: predicated region body
PF: predicated region fallthrough
CT: control target
= control target key end

     0   :  { %7 = vsyncpa [#allocation3], 0  ;;  %s187_s0 = inlined_call_operand.hbm [shape: f32[16,128], index: 0, kind: input, shape index: {}]   ;;  %s188_s1 = inlined_call_operand.hbm [shape: f32[16,128], index: 1, kind: input, shape index: {}]   ;;  %s189_s2 = inlined_call_operand.vmem [shape: f32[16,1], index: 2, kind: output, shape index: {}]  }
   0x1   :  { %8 = vsyncpa [#allocation5], 0  ;;  %s138_s9 = smov [#allocation2]   ;;  %s90_s13 = scalar_lea.hbm %s187_s0, 256 }
   0x2   :  { %s14_s10 = sshll.u32 %s138_s9, 4  ;;  %p91_p0 = scmp.ne.s32.totalorder %s187_s0, %s90_s13  ;;  %s15_s10 = int_to_ptr.vmem [resolvable:$true] %s14_s10 }
   0x3   :  { %p94_p1 = scmp.lt.u32.totalorder %s90_s13, %s187_s0 }
   0x5   :  { %p96_p2 = pnand %p94_p1, %p91_p0 }
   0x7   :  { %99 = shalt.err (!%p96_p2)
}
   0x8   :  { %s100_s18 = scalar_lea.vmem %s15_s10, 256  ;;  %p105_p4 = scmp.lt.s32.totalorder %s15_s10, %s15_s10 }
   0x9   :  { %p101_p3 = scmp.ne.s32.totalorder %s15_s10, %s100_s18  ;;  %p106_p5 = scmp.lt.s32.totalorder %s100_s18, %s100_s18 }
   0xb   :  { %p107_p6 = por %p106_p5, %p105_p4 }
   0xd   :  { %p108_p7 = pnand %p107_p6, %p101_p3 }
   0xf   :  { %111 = shalt.err (!%p108_p7)
}
  0x10   :  { %s139_s19 = smov 128   ;;  %s140_s20 = smov 8  }
  0x11   :  { %20 = dma.hbm_to_vmem [thread:$0]  %s187_s0, 256, %s15_s10, [#allocation3], %s139_s19, %s139_s19, %s140_s20  }
  0x12   :  { %s141_s23 = smov [#allocation4]   ;;  %s112_s27 = scalar_lea.hbm %s188_s1, 256 }
  0x13   :  { %s26_s24 = sshll.u32 %s141_s23, 4  ;;  %p113_p8 = scmp.ne.s32.totalorder %s188_s1, %s112_s27  ;;  %s27_s24 = int_to_ptr.vmem [resolvable:$true] %s26_s24 }
  0x14   :  { %p116_p9 = scmp.lt.u32.totalorder %s112_s27, %s188_s1 }
  0x16   :  { %p118_p10 = pnand %p116_p9, %p113_p8 }
  0x18   :  { %121 = shalt.err (!%p118_p10)
}
  0x19   :  { %s122_s4 = scalar_lea.vmem %s27_s24, 256  ;;  %p127_p12 = scmp.lt.s32.totalorder %s27_s24, %s27_s24 }
  0x1a   :  { %p123_p11 = scmp.ne.s32.totalorder %s27_s24, %s122_s4  ;;  %p128_p13 = scmp.lt.s32.totalorder %s122_s4, %s122_s4 }
  0x1c   :  { %p129_p0 = por %p128_p13, %p127_p12 }
  0x1e   :  { %p130_p1 = pnand %p129_p0, %p123_p11 }
  0x20   :  { %133 = shalt.err (!%p130_p1)
}
  0x21   :  { %32 = dma.hbm_to_vmem [thread:$0]  %s188_s1, 256, %s27_s24, [#allocation5], %s139_s19, %s139_s19, %s140_s20  }
  0x22   :  { %134 = dma.done.wait [#allocation3], 256  }
  0x23   :  { %135 = vsyncadd [#allocation3], 4294967040 }
  0x24   :  { %136 = dma.done.wait [#allocation5], 256  }
  0x25   :  { %137 = vsyncadd [#allocation5], 4294967040  ;;  %v39_v0 = vld [vmem:[#allocation2] sm:$0xff]  ;;  %v40_v1 = vld [vmem:[#allocation2 + $0x8] sm:$0xff]  ;;  %vm69_vm0 = vcmask 7168  }
  0x26   :  { %43 = vmax.xlane.f32.xlu0 %v39_v0  ;;  %v41_v14 = vld [vmem:[#allocation4] sm:$0xff]  ;;  %v42_v19 = vld [vmem:[#allocation4 + $0x8] sm:$0xff] }
  0x2a   :  { %45 = vmax.xlane.f32.xlu0 %v40_v1 }
  0xb3   :  { %v44_v2 = vpop.xlane.xlu0 %43 }
  0xb4   :  { %v47_v3 = vsub.f32 %v39_v0, %v44_v2 }
  0xb6   :  { %v49_v4 = vmul.f32 1.442695, %v47_v3 }
  0xb7   :  { %v46_v5 = vpop.xlane.xlu0 %45 }
  0xb8   :  { %v48_v6 = vsub.f32 %v40_v1, %v46_v5  ;;  %82 = vpow2.f32 %v49_v4 }
  0xba   :  { %v51_v7 = vmul.f32 1.442695, %v48_v6 }
  0xbc   :  { %84 = vpow2.f32 %v51_v7 }
  0xc2   :  { %v83_v8 = vpop.eup %82 }
  0xc3   :  { %53 = vadd.xlane.f32.xlu1 %v83_v8 }
  0xc6   :  { %v85_v9 = vpop.eup %84 }
  0xc7   :  { %55 = vadd.xlane.f32.xlu1 %v85_v9 }
 0x150   :  { %v54_v10 = vpop.xlane.xlu1 %53 }
 0x151   :  { %86 = vlog2.f32 %v54_v10 }
 0x154   :  { %v56_v11 = vpop.xlane.xlu1 %55 }
 0x155   :  { %88 = vlog2.f32 %v56_v11 }
 0x15b   :  { %v87_v12 = vpop.eup %86 }
 0x15c   :  { %v58_v13 = vmul.f32 0.6931472, %v87_v12 }
 0x15e   :  { %v61_v15 = vsub.f32 %v58_v13, %v47_v3 }
 0x15f   :  { %v89_v16 = vpop.eup %88 }
 0x160   :  { %v60_v17 = vmul.f32 0.6931472, %v89_v16  ;;  %v63_v18 = vmul.f32 %v61_v15, %v41_v14 }
 0x162   :  { %65 = vadd.xlane.f32.xlu0 %v63_v18  ;;  %v62_v20 = vsub.f32 %v60_v17, %v48_v6 }
 0x164   :  { %v64_v21 = vmul.f32 %v62_v20, %v42_v19 }
 0x166   :  { %67 = vadd.xlane.f32.xlu1 %v64_v21 }
 0x1ef   :  { %v66_v22 = vpop.xlane.xlu0 %65 }
 0x1f0   :  { %70 = vst.msk [vmem:[%s189_s2] sm:$0xff] %vm69_vm0, %v66_v22 }
 0x1f3   :  { %v68_v23 = vpop.xlane.xlu1 %67 }
 0x1f4   :  { %71 = vst.msk [vmem:[%s189_s2 + $0x8] sm:$0xff] %vm69_vm0, %v68_v23 }
 0x1f5   :  { %76 = vsyncpa [#allocation3], 1 }
 0x1f6   :  { %77 = vsyncpa [#allocation5], 1 }

</bundles_post_ra>
